<compile_context>
chip_gen: v5e
topology: v5e:2x2
jax: 0.10.0
libtpu: 0.0.40
codegen_flags: <defaults>
</compile_context>

<pallas_src>
import functools

import jax
import jax.numpy as jnp
from jax import lax
from jax.experimental import pallas as pl
from jax.experimental.pallas import tpu as pltpu


def _round_up(a, b):
    return (a + b - 1) // b * b


def _fc1_max_kernel(*refs, n_valid, tile_rows, tiles_per_split, n_tiles,
                    mask_rows, fuse_epilogue):
    if fuse_epilogue:
        x_ref, w1_ref, b1_ref, w2_ref, b2_ref, out_ref, acc_ref = refs
    else:
        x_ref, w1_ref, out_ref, acc_ref = refs

    i = pl.program_id(0)          # megacore split ("parallel")
    j = pl.program_id(1)          # instance-tile reduction ("arbitrary")
    feat = acc_ref.shape[-1]

    @pl.when(j == 0)
    def _():
        acc_ref[...] = jnp.full(acc_ref.shape, -jnp.inf, acc_ref.dtype)

    # fc1 on the MXU in bf16 with f32 accumulation.  Bias + ReLU are deferred
    # past the max (both monotone & instance-invariant, so they commute).
    # The astype is a no-op if the caller already supplies bf16 activations.
    # TODO(synk): for large-N / v6e, produce x in bf16 upstream (fused into its
    # producer) to halve HBM traffic; a standalone wrapper cast pass would just
    # re-introduce an extra HBM round trip.  fp8 on v7x is a further option
    # once compute-bound.
    h = jnp.dot(x_ref[...].astype(jnp.bfloat16), w1_ref[...],
                preferred_element_type=jnp.float32)          # (tile_rows, feat)

    def fold(hv):
        # Fold into an (8, feat) vreg-dense running max: the reshape splits the
        # sublane axis at its natural (8,) tiling boundary, so the axis-0 reduce
        # is pure elementwise VPU max (no per-step cross-sublane XLU reduce).
        tm8 = jnp.max(hv.reshape(tile_rows // 8, 8, feat), axis=0)
        acc_ref[...] = jnp.maximum(acc_ref[...], tm8)

    if mask_rows:
        # Only the globally-last tile is ragged.  Ghost tiles of an uneven
        # 2-way split are clamped onto it by the index_map; using the same
        # clamped tile index here keeps the row mask consistent, and max is
        # idempotent so re-processing the edge tile is harmless.
        tile_idx = jnp.minimum(i * tiles_per_split + j, n_tiles - 1)
        is_edge = tile_idx == n_tiles - 1

        @pl.when(jnp.logical_not(is_edge))
        def _():
            fold(h)

        @pl.when(is_edge)
        def _():
            rows = tile_idx * tile_rows + lax.broadcasted_iota(
                jnp.int32, (tile_rows, 1), 0)
            # Padded / garbage rows of the edge block can never win the max.
            fold(jnp.where(rows < n_valid, h, -jnp.inf))
    else:
        fold(h)

    @pl.when(j == pl.num_programs(1) - 1)
    def _():
        if fuse_epilogue:
            # Small-N finalize fused in-kernel: 8->1 sublane max, deferred
            # bias + ReLU, then the tiny fc2 in f32.  W2/b2 were zero-padded to
            # a lane-dense 128-wide block by the wrapper; the matmul is done on
            # 8 identical rows (sublane broadcast) and the wrapper keeps row 0.
            pooled = jnp.max(acc_ref[...], axis=0, keepdims=True)      # (1, feat)
            pooled = jnp.maximum(pooled + b1_ref[...], 0.0)
            pooled8 = jnp.broadcast_to(pooled, (8, feat))
            logits8 = jnp.dot(pooled8, w2_ref[...],
                              preferred_element_type=jnp.float32) + b2_ref[...]
            out_ref[...] = logits8
        else:
            out_ref[...] = acc_ref[...]


@functools.partial(jax.jit, static_argnames=("input_size", "tile_n"))
def maxpooling_forward(x, w1, b1, w2, b2, *, input_size, tile_n=1024):
    """Pallas implementation of MaxPooling.forward.

    x:  (N, D) with D >= input_size
    w1: (input_size, feat_size), b1: (feat_size,)
    w2: (feat_size, n_classes),  b2: (n_classes,)
    Returns (logits, Y_hat, Y_prob, None, Y_hat) with a leading bag dim of 1.
    """
    assert tile_n % 8 == 0, "tile_n must be a multiple of 8 (sublane tiling)"
    n, d = x.shape
    assert d >= input_size
    feat_size = w1.shape[1]
    n_classes = w2.shape[1]

    # --- K (feature-input) block -------------------------------------------
    # The [:input_size] column prefix is selected by the BlockSpec (no HBM
    # pass over x).  If input_size is not lane-aligned, round the block up (or
    # to all of d) and zero-pad W1's rows once so the extra columns contribute
    # exactly zero.
    if input_size == d or input_size % 128 == 0:
        k_block, w1_k = input_size, w1
    else:
        k_block = min(d, _round_up(input_size, 128))
        w1_k = jnp.pad(w1, ((0, k_block - input_size), (0, 0)))

    # --- Instance tiling -----------------------------------------------------
    # A single tile covering all of N when N is small, otherwise tile_n rows.
    # No padding of x: the ragged last tile is masked in-kernel.
    tile_rows = min(tile_n, _round_up(n, 8))
    n_tiles = pl.cdiv(n, tile_rows)
    mask_rows = (n % tile_rows) != 0
    # 2-way split over instance tiles whenever possible ("parallel" axis ->
    # both TensorCores on v7x; inert on single-TC v5e/v6e).
    num_splits = 2 if n_tiles >= 2 else 1
    tiles_per_split = pl.cdiv(n_tiles, num_splits)
    fuse_epilogue = num_splits == 1   # small-N: fuse bias/ReLU/fc2 in-kernel

    w1_bf16 = w1_k.astype(jnp.bfloat16)   # grid-invariant: DMA'd to VMEM once

    def x_index_map(i, j):
        # Clamp ghost tiles of an uneven split onto the last real tile.
        return (jnp.minimum(i * tiles_per_split + j, n_tiles - 1), 0)

    x_spec = pl.BlockSpec((tile_rows, k_block), x_index_map)
    w1_spec = pl.BlockSpec((k_block, feat_size), lambda i, j: (0, 0))
    # TODO(synk): if feat/input sizes grow, single-buffer the grid-invariant
    # weight blocks (pipeline_mode=pl.Buffered(1)) and set vmem_limit_bytes to
    # re-budget against v7x's 64 MiB VMEM.

    kernel = functools.partial(
        _fc1_max_kernel, n_valid=n, tile_rows=tile_rows,
        tiles_per_split=tiles_per_split, n_tiles=n_tiles,
        mask_rows=mask_rows, fuse_epilogue=fuse_epilogue)

    cparams = pltpu.CompilerParams(
        dimension_semantics=("parallel", "arbitrary"))

    if fuse_epilogue:
        ncls_pad = _round_up(n_classes, 128)
        w2_pad = jnp.pad(w2.astype(jnp.float32),
                         ((0, 0), (0, ncls_pad - n_classes)))
        b2_pad = jnp.pad(b2.astype(jnp.float32).reshape(1, n_classes),
                         ((0, 0), (0, ncls_pad - n_classes)))
        b1_row = b1.astype(jnp.float32).reshape(1, feat_size)

        logits_pad = pl.pallas_call(
            kernel,
            out_shape=jax.ShapeDtypeStruct((8, ncls_pad), jnp.float32),
            grid_spec=pltpu.PrefetchScalarGridSpec(
                num_scalar_prefetch=0,
                grid=(num_splits, tiles_per_split),
                in_specs=[
                    x_spec, w1_spec,
                    pl.BlockSpec((1, feat_size), lambda i, j: (0, 0)),
                    pl.BlockSpec((feat_size, ncls_pad), lambda i, j: (0, 0)),
                    pl.BlockSpec((1, ncls_pad), lambda i, j: (0, 0)),
                ],
                out_specs=pl.BlockSpec((8, ncls_pad), lambda i, j: (0, 0)),
                scratch_shapes=[pltpu.VMEM((8, feat_size), jnp.float32)]),
            compiler_params=cparams,
        )(x, w1_bf16, b1_row, w2_pad, b2_pad)
        logits = logits_pad[0:1, :n_classes]
    else:
        partial_max = pl.pallas_call(
            kernel,
            out_shape=jax.ShapeDtypeStruct((num_splits * 8, feat_size),
                                           jnp.float32),
            grid_spec=pltpu.PrefetchScalarGridSpec(
                num_scalar_prefetch=0,
                grid=(num_splits, tiles_per_split),
                in_specs=[x_spec, w1_spec],
                out_specs=pl.BlockSpec((8, feat_size), lambda i, j: (i, 0)),
                scratch_shapes=[pltpu.VMEM((8, feat_size), jnp.float32)]),
            compiler_params=cparams,
        )(x, w1_bf16)
        # Tiny cross-split epilogue in plain JAX: combine the per-split
        # per-sublane partial maxes, apply the deferred bias + ReLU, fc2.
        pooled = jnp.max(partial_max, axis=0, keepdims=True)         # (1, feat)
        pooled = jnp.maximum(
            pooled + b1.astype(jnp.float32).reshape(1, feat_size), 0.0)
        logits = (pooled @ w2.astype(jnp.float32)
                  + b2.astype(jnp.float32).reshape(1, n_classes))

    y_hat = jnp.argmax(logits, axis=-1)
    y_prob = jax.nn.softmax(logits, axis=-1)
    return logits, y_hat, y_prob, None, y_hat


def _reference_forward(x, w1, b1, w2, b2, input_size):
    h = x[:, :input_size]
    h = jnp.maximum(h @ w1 + b1, 0.0)
    pooled = jnp.max(h, axis=0, keepdims=True)
    return pooled @ w2 + b2


if __name__ == "__main__":
    n_classes = 4
    input_size = 384
    feat_size = 384

    key = jax.random.PRNGKey(0)
    kx, k1, kb1, k2, kb2, kx2 = jax.random.split(key, 6)

    # Deterministic synthetic parameters (PyTorch Linear shapes, stored (in, out)).
    w1 = jax.random.normal(k1, (input_size, feat_size), jnp.float32) * 0.05
    b1 = jax.random.normal(kb1, (feat_size,), jnp.float32) * 0.05
    w2 = jax.random.normal(k2, (feat_size, n_classes), jnp.float32) * 0.05
    b2 = jax.random.normal(kb2, (n_classes,), jnp.float32) * 0.05
    # TODO(synk): _fc0 (Linear(feat_size, 1)) is defined in __init__ but never
    # used in forward, so it is intentionally omitted.

    # Case 1: small bag (N=64) -> single tile, fully fused in-kernel epilogue.
    x_small = jax.random.normal(kx, (64, input_size), jnp.float32)
    logits, y_hat, y_prob, _, _ = maxpooling_forward(
        x_small, w1, b1, w2, b2, input_size=input_size)
    jax.block_until_ready((logits, y_hat, y_prob))
    ref = _reference_forward(x_small, w1, b1, w2, b2, input_size)
    # bf16 MXU inputs (f32 accumulate) -> slightly looser tolerance than pure f32.
    assert jnp.allclose(logits, ref, atol=3e-2, rtol=3e-2), (logits, ref)
    assert logits.shape == (1, n_classes)
    assert y_hat.shape == (1,)
    assert y_prob.shape == (1, n_classes)

    # Case 2: larger ragged bag (N=520, tile=128) -> odd tile count (5) with a
    # 2-way split + clamped ghost tile, ragged last tile masked in-kernel.
    x_big = jax.random.normal(kx2, (520, input_size), jnp.float32)
    logits_b, y_hat_b, y_prob_b, _, _ = maxpooling_forward(
        x_big, w1, b1, w2, b2, input_size=input_size, tile_n=128)
    jax.block_until_ready((logits_b, y_hat_b, y_prob_b))
    ref_b = _reference_forward(x_big, w1, b1, w2, b2, input_size)
    assert jnp.allclose(logits_b, ref_b, atol=3e-2, rtol=3e-2), (logits_b, ref_b)
    assert logits_b.shape == (1, n_classes)

    print("KERNEL_OK")
</pallas_src>

<mosaic_0001>
module attributes {stable_mosaic.version = 11 : i64} {
  func.func @_fc1_max_kernel(%arg0: i32, %arg1: i32, %arg2: memref<64x384xf32, #tpu.memory_space<vmem>>, %arg3: memref<384x384xbf16, #tpu.memory_space<vmem>>, %arg4: memref<1x384xf32, #tpu.memory_space<vmem>>, %arg5: memref<384x128xf32, #tpu.memory_space<vmem>>, %arg6: memref<1x128xf32, #tpu.memory_space<vmem>>, %arg7: memref<8x128xf32, #tpu.memory_space<vmem>>, %arg8: memref<8x384xf32, #tpu.memory_space<vmem>>) attributes {dimension_semantics = [#tpu.dimension_semantics<parallel>, #tpu.dimension_semantics<arbitrary>], iteration_bounds = array<i64: 1, 1>, scalar_prefetch = 0 : i64, scratch_operands = 1 : i64, tpu.core_type = #tpu.core_type<tc>, window_params = [{transform_indices = @transform_0, window_bounds = array<i64: 64, 384>}, {pipeline_mode = #tpu.pipeline_mode<synchronous>, transform_indices = @transform_1, window_bounds = array<i64: 384, 384>}, {pipeline_mode = #tpu.pipeline_mode<synchronous>, transform_indices = @transform_2, window_bounds = array<i64: 1, 384>}, {pipeline_mode = #tpu.pipeline_mode<synchronous>, transform_indices = @transform_3, window_bounds = array<i64: 384, 128>}, {pipeline_mode = #tpu.pipeline_mode<synchronous>, transform_indices = @transform_4, window_bounds = array<i64: 1, 128>}, {pipeline_mode = #tpu.pipeline_mode<synchronous>, transform_indices = @transform_5, window_bounds = array<i64: 8, 128>}]} {
    %c0_i32 = arith.constant 0 : i32
    %0 = arith.cmpi eq, %arg1, %c0_i32 : i32
    %1 = arith.extui %0 : i1 to i32
    %c0_i32_0 = arith.constant 0 : i32
    %2 = arith.cmpi ne, %1, %c0_i32_0 : i32
    scf.if %2 {
      %cst_11 = arith.constant 0xFF800000 : f32
      %15 = vector.broadcast %cst_11 : f32 to vector<8x384xf32>
      %c0_12 = arith.constant 0 : index
      %c0_13 = arith.constant 0 : index
      %16 = vector.load %arg8[%c0_12, %c0_13] : memref<8x384xf32, #tpu.memory_space<vmem>>, vector<8x384xf32>
      tpu.vector_store %arg8[%c0_12, %c0_13], %15 {strides = array<i32>} : memref<8x384xf32, #tpu.memory_space<vmem>>, vector<8x384xf32>,
    } else {
    }
    %c0 = arith.constant 0 : index
    %c0_1 = arith.constant 0 : index
    %3 = vector.load %arg2[%c0, %c0_1] : memref<64x384xf32, #tpu.memory_space<vmem>>, vector<64x384xf32>
    %4 = arith.truncf %3 : vector<64x384xf32> to vector<64x384xbf16>
    %c0_2 = arith.constant 0 : index
    %c0_3 = arith.constant 0 : index
    %5 = vector.load %arg3[%c0_2, %c0_3] : memref<384x384xbf16, #tpu.memory_space<vmem>>, vector<384x384xbf16>
    %cst = arith.constant dense<0.000000e+00> : vector<64x384xf32>
    %6 = tpu.matmul %4, %5, %cst {dimension_numbers = #tpu.dot_dimension_numbers<[1], [0], [0], [1], [0, 0, 1, 1], [], []>} : vector<64x384xbf16>, vector<384x384xbf16>, vector<64x384xf32> -> vector<64x384xf32>
    %7 = vector.shape_cast %6 : vector<64x384xf32> to vector<8x8x384xf32>
    %cst_4 = arith.constant dense<0xFF800000> : vector<8x384xf32>
    %8 = vector.multi_reduction <maximumf>, %7, %cst_4 [0] : vector<8x8x384xf32> to vector<8x384xf32>
    %c0_5 = arith.constant 0 : index
    %c0_6 = arith.constant 0 : index
    %9 = vector.load %arg8[%c0_5, %c0_6] : memref<8x384xf32, #tpu.memory_space<vmem>>, vector<8x384xf32>
    %10 = arith.maximumf %9, %8 : vector<8x384xf32>
    %c0_7 = arith.constant 0 : index
    %c0_8 = arith.constant 0 : index
    %11 = vector.load %arg8[%c0_7, %c0_8] : memref<8x384xf32, #tpu.memory_space<vmem>>, vector<8x384xf32>
    tpu.vector_store %arg8[%c0_7, %c0_8], %10 {strides = array<i32>} : memref<8x384xf32, #tpu.memory_space<vmem>>, vector<8x384xf32>,
    %c0_i32_9 = arith.constant 0 : i32
    %12 = arith.cmpi eq, %arg1, %c0_i32_9 : i32
    %13 = arith.extui %12 : i1 to i32
    %c0_i32_10 = arith.constant 0 : i32
    %14 = arith.cmpi ne, %13, %c0_i32_10 : i32
    scf.if %14 {
      %c0_11 = arith.constant 0 : index
      %c0_12 = arith.constant 0 : index
      %15 = vector.load %arg8[%c0_11, %c0_12] : memref<8x384xf32, #tpu.memory_space<vmem>>, vector<8x384xf32>
      %cst_13 = arith.constant dense<0xFF800000> : vector<384xf32>
      %16 = vector.multi_reduction <maximumf>, %15, %cst_13 [0] : vector<8x384xf32> to vector<384xf32>
      %17 = vector.shape_cast %16 : vector<384xf32> to vector<1x384xf32>
      %c0_14 = arith.constant 0 : index
      %c0_15 = arith.constant 0 : index
      %18 = vector.load %arg4[%c0_14, %c0_15] : memref<1x384xf32, #tpu.memory_space<vmem>>, vector<1x384xf32>
      %19 = arith.addf %17, %18 : vector<1x384xf32>
      %cst_16 = arith.constant 0.000000e+00 : f32
      %20 = vector.broadcast %cst_16 : f32 to vector<1x384xf32>
      %21 = arith.maximumf %19, %20 : vector<1x384xf32>
      %22 = vector.shape_cast %21 : vector<1x384xf32> to vector<1x384xf32>
      %23 = vector.broadcast %22 : vector<1x384xf32> to vector<8x384xf32>
      %c0_17 = arith.constant 0 : index
      %c0_18 = arith.constant 0 : index
      %24 = vector.load %arg5[%c0_17, %c0_18] : memref<384x128xf32, #tpu.memory_space<vmem>>, vector<384x128xf32>
      %cst_19 = arith.constant dense<0.000000e+00> : vector<8x128xf32>
      %25 = tpu.matmul %23, %24, %cst_19 {dimension_numbers = #tpu.dot_dimension_numbers<[1], [0], [0], [1], [0, 0, 1, 1], [], []>} : vector<8x384xf32>, vector<384x128xf32>, vector<8x128xf32> -> vector<8x128xf32>
      %c0_20 = arith.constant 0 : index
      %c0_21 = arith.constant 0 : index
      %26 = vector.load %arg6[%c0_20, %c0_21] : memref<1x128xf32, #tpu.memory_space<vmem>>, vector<1x128xf32>
      %27 = vector.broadcast %26 : vector<1x128xf32> to vector<8x128xf32>
      %28 = arith.addf %25, %27 : vector<8x128xf32>
      %c0_22 = arith.constant 0 : index
      %c0_23 = arith.constant 0 : index
      %29 = vector.load %arg7[%c0_22, %c0_23] : memref<8x128xf32, #tpu.memory_space<vmem>>, vector<8x128xf32>
      tpu.vector_store %arg7[%c0_22, %c0_23], %28 {strides = array<i32>} : memref<8x128xf32, #tpu.memory_space<vmem>>, vector<8x128xf32>,
    } else {
    }
    return
  }
  func.func @transform_0(%arg0: i32, %arg1: i32) -> (i32, i32) {
    %c1_i32 = arith.constant 1 : i32
    %0 = arith.muli %arg0, %c1_i32 : i32
    %1 = arith.addi %0, %arg1 : i32
    %c0_i32 = arith.constant 0 : i32
    %2 = arith.minsi %1, %c0_i32 : i32
    %c0_i32_0 = arith.constant 0 : i32
    %c0_i32_1 = arith.constant 0 : i32
    return %2, %c0_i32_0 : i32, i32
  }
  func.func @transform_1(%arg0: i32, %arg1: i32) -> (i32, i32) {
    %c0_i32 = arith.constant 0 : i32
    %c0_i32_0 = arith.constant 0 : i32
    %c0_i32_1 = arith.constant 0 : i32
    return %c0_i32, %c0_i32_0 : i32, i32
  }
  func.func @transform_2(%arg0: i32, %arg1: i32) -> (i32, i32) {
    %c0_i32 = arith.constant 0 : i32
    %c0_i32_0 = arith.constant 0 : i32
    %c0_i32_1 = arith.constant 0 : i32
    return %c0_i32, %c0_i32_0 : i32, i32
  }
  func.func @transform_3(%arg0: i32, %arg1: i32) -> (i32, i32) {
    %c0_i32 = arith.constant 0 : i32
    %c0_i32_0 = arith.constant 0 : i32
    %c0_i32_1 = arith.constant 0 : i32
    return %c0_i32, %c0_i32_0 : i32, i32
  }
  func.func @transform_4(%arg0: i32, %arg1: i32) -> (i32, i32) {
    %c0_i32 = arith.constant 0 : i32
    %c0_i32_0 = arith.constant 0 : i32
    %c0_i32_1 = arith.constant 0 : i32
    return %c0_i32, %c0_i32_0 : i32, i32
  }
  func.func @transform_5(%arg0: i32, %arg1: i32) -> (i32, i32) {
    %c0_i32 = arith.constant 0 : i32
    %c0_i32_0 = arith.constant 0 : i32
    %c0_i32_1 = arith.constant 0 : i32
    return %c0_i32, %c0_i32_0 : i32, i32
  }
}

</mosaic_0001>

<bundles_post_ra>
// kernel: maxpooling_forward.1
= control target key start
LH: loop header
LB: loop body
LE: loop exit
PB: predicated region body
PF: predicated region fallthrough
CT: control target
= control target key end

     0   :  { %s2212_s1 = inlined_call_operand.vmem [shape: bf16[384,384], index: 1, kind: input, shape index: {}]   ;;  %s2213_s0 = inlined_call_operand.vmem [shape: f32[64,384], index: 0, kind: input, shape index: {}]   ;;  %s2214_s3 = inlined_call_operand.vmem [shape: f32[384,128], index: 3, kind: input, shape index: {}]   ;;  %s2215_s4 = inlined_call_operand.vmem [shape: f32[1,128], index: 4, kind: input, shape index: {}]   ;;  %s2216_s2 = inlined_call_operand.vmem [shape: f32[1,384], index: 2, kind: input, shape index: {}]   ;;  %s2217_s5 = inlined_call_operand.vmem [shape: f32[8,128], index: 5, kind: output, shape index: {}]  }
   0x1   :  { %v1119_v0 = vld [vmem:[%s2212_s1 + $0xa8] sm:$0xf]  ;;  %v1343_v1 = vld [vmem:[%s2212_s1 + $0xb0] sm:$0xf0]  ;;  %v1107_v2 = vld [vmem:[%s2212_s1 + $0x90] sm:$0xf] }
   0x2   :  { %v1120_v3 = vor.u32 %v1343_v1, %v1119_v0  ;;  %v1340_v4 = vld [vmem:[%s2212_s1 + $0x98] sm:$0xf0]  ;;  %v1095_v6 = vld [vmem:[%s2212_s1 + $0x78] sm:$0xf]  ;;  %v1311_v7 = vld [vmem:[%s2212_s1 + $0x228] sm:$0xf] }
   0x3   :  { %v1108_v5 = vor.u32 %v1340_v4, %v1107_v2  ;;  %v1391_v8 = vld [vmem:[%s2212_s1 + $0x230] sm:$0xf0]  ;;  %v1337_v9 = vld [vmem:[%s2212_s1 + $0x80] sm:$0xf0]  ;;  %v1342_v11 = vld [vmem:[%s2212_s1 + $0xac] sm:$0xf] }
   0x4   :  { %578 = vmatpush.bf16.msra.mxu0 %v1120_v3  ;;  %1393 = vmatpush.bf16.msra.mxu1 %v1120_v3  ;;  %v1312_v10 = vor.u32 %v1391_v8, %v1311_v7  ;;  %v1121_v12 = vld [vmem:[%s2212_s1 + $0xb4] sm:$0xf0]  ;;  %v1299_v14 = vld [vmem:[%s2212_s1 + $0x210] sm:$0xf]  ;;  %v1388_v15 = vld [vmem:[%s2212_s1 + $0x218] sm:$0xf0]  ;;  %v1096_v19 = vor.u32 %v1337_v9, %v1095_v6 }
   0x5   :  { %v1124_v13 = vor.u32 %v1342_v11, %v1121_v12  ;;  %v1300_v16 = vor.u32 %v1388_v15, %v1299_v14  ;;  %v1339_v17 = vld [vmem:[%s2212_s1 + $0x94] sm:$0xf]  ;;  %v1109_v18 = vld [vmem:[%s2212_s1 + $0x9c] sm:$0xf0]  ;;  %v1287_v20 = vld [vmem:[%s2212_s1 + $0x1f8] sm:$0xf] }
   0x6   :  { %636 = vmatpush.bf16.msra.mxu2 %v1312_v10  ;;  %v1385_v21 = vld [vmem:[%s2212_s1 + $0x200] sm:$0xf0]  ;;  %v1083_v22 = vld [vmem:[%s2212_s1 + $0x60] sm:$0xf]  ;;  %v1334_v23 = vld [vmem:[%s2212_s1 + $0x68] sm:$0xf0]  ;;  %v1112_v24 = vor.u32 %v1339_v17, %v1109_v18 }
   0x7   :  { %665 = vmatpush.bf16.msra.mxu3 %v1124_v13  ;;  %v1336_v25 = vld [vmem:[%s2212_s1 + $0x7c] sm:$0xf]  ;;  %v1097_v26 = vld [vmem:[%s2212_s1 + $0x84] sm:$0xf0]  ;;  %v1288_v27 = vor.u32 %v1385_v21, %v1287_v20  ;;  %v1084_v28 = vor.u32 %v1334_v23, %v1083_v22  ;;  %v1275_v29 = vld [vmem:[%s2212_s1 + $0x1e0] sm:$0xf] }
   0x8   :  { %579 = vmatpush.bf16.msra.mxu0 %v1108_v5  ;;  %1394 = vmatpush.bf16.msra.mxu1 %v1108_v5  ;;  %v1382_v30 = vld [vmem:[%s2212_s1 + $0x1e8] sm:$0xf0]  ;;  %v1071_v31 = vld [vmem:[%s2212_s1 + $0x48] sm:$0xf]  ;;  %v1331_v32 = vld [vmem:[%s2212_s1 + $0x50] sm:$0xf0]  ;;  %v1100_v33 = vor.u32 %v1336_v25, %v1097_v26 }
   0x9   :  { %v1333_v34 = vld [vmem:[%s2212_s1 + $0x64] sm:$0xf]  ;;  %v1085_v35 = vld [vmem:[%s2212_s1 + $0x6c] sm:$0xf0]  ;;  %v1276_v36 = vor.u32 %v1382_v30, %v1275_v29  ;;  %v1072_v37 = vor.u32 %v1331_v32, %v1071_v31  ;;  %v1263_v38 = vld [vmem:[%s2212_s1 + $0x1c8] sm:$0xf] }
   0xa   :  { %637 = vmatpush.bf16.msra.mxu2 %v1300_v16  ;;  %v1379_v39 = vld [vmem:[%s2212_s1 + $0x1d0] sm:$0xf0]  ;;  %v1059_v40 = vld [vmem:[%s2212_s1 + $0x30] sm:$0xf]  ;;  %v1328_v41 = vld [vmem:[%s2212_s1 + $0x38] sm:$0xf0]  ;;  %v1088_v42 = vor.u32 %v1333_v34, %v1085_v35 }
   0xb   :  { %666 = vmatpush.bf16.msra.mxu3 %v1112_v24  ;;  %v1330_v43 = vld [vmem:[%s2212_s1 + $0x4c] sm:$0xf]  ;;  %v1073_v44 = vld [vmem:[%s2212_s1 + $0x54] sm:$0xf0]  ;;  %v1264_v45 = vor.u32 %v1379_v39, %v1263_v38  ;;  %v1060_v46 = vor.u32 %v1328_v41, %v1059_v40  ;;  %v1251_v47 = vld [vmem:[%s2212_s1 + $0x1b0] sm:$0xf] }
   0xc   :  { %580 = vmatpush.bf16.msra.mxu0 %v1096_v19  ;;  %1395 = vmatpush.bf16.msra.mxu1 %v1096_v19  ;;  %v1376_v48 = vld [vmem:[%s2212_s1 + $0x1b8] sm:$0xf0]  ;;  %v1047_v49 = vld [vmem:[%s2212_s1 + $0x18] sm:$0xf]  ;;  %v1325_v50 = vld [vmem:[%s2212_s1 + $0x20] sm:$0xf0]  ;;  %v1076_v51 = vor.u32 %v1330_v43, %v1073_v44 }
   0xd   :  { %v1327_v52 = vld [vmem:[%s2212_s1 + $0x34] sm:$0xf]  ;;  %v1061_v53 = vld [vmem:[%s2212_s1 + $0x3c] sm:$0xf0]  ;;  %v1252_v54 = vor.u32 %v1376_v48, %v1251_v47  ;;  %v1048_v55 = vor.u32 %v1325_v50, %v1047_v49  ;;  %v1239_v56 = vld [vmem:[%s2212_s1 + $0x198] sm:$0xf] }
   0xe   :  { %638 = vmatpush.bf16.msra.mxu2 %v1288_v27  ;;  %v1373_v57 = vld [vmem:[%s2212_s1 + $0x1a0] sm:$0xf0]  ;;  %v1035_v58 = vld [vmem:[%s2212_s1] sm:$0xf]  ;;  %v1322_v59 = vld [vmem:[%s2212_s1 + $0x8] sm:$0xf0]  ;;  %v1064_v61 = vor.u32 %v1327_v52, %v1061_v53 }
   0xf   :  { %667 = vmatpush.bf16.msra.mxu3 %v1100_v33  ;;  %v1215_v60 = vld [vmem:[%s2212_s1 + $0x168] sm:$0xf]  ;;  %v62_v62 = vld [vmem:[%s2213_s0] sm:$0xff]  ;;  %v65_v63 = vld [vmem:[%s2213_s0 + $0x18] sm:$0xff]  ;;  %v1240_v4 = vor.u32 %v1373_v57, %v1239_v56  ;;  %v1036_v7 = vor.u32 %v1322_v59, %v1035_v58 }
  0x10   :  { %581 = vmatpush.bf16.msra.mxu0 %v1084_v28  ;;  %1396 = vmatpush.bf16.msra.mxu1 %v1084_v28  ;;  %v1367_v0 = vld [vmem:[%s2212_s1 + $0x170] sm:$0xf0]  ;;  %v1366_v1 = vld [vmem:[%s2212_s1 + $0x16c] sm:$0xf]  ;;  %v1217_v2 = vld [vmem:[%s2212_s1 + $0x174] sm:$0xf0]  ;;  %v1612_v20 = vpack.c.bf16 %v65_v63, %v62_v62 }
  0x11   :  { %v74_v3 = vld [vmem:[%s2213_s0 + $0x60] sm:$0xff]  ;;  %v1324_v5 = vld [vmem:[%s2212_s1 + $0x1c] sm:$0xf]  ;;  %v1049_v6 = vld [vmem:[%s2212_s1 + $0x24] sm:$0xf0]  ;;  %v1216_v11 = vor.u32 %v1367_v0, %v1215_v60  ;;  %v1220_v12 = vor.u32 %v1366_v1, %v1217_v2 }
  0x12   :  { %639 = vmatpush.bf16.msra.mxu2 %v1276_v36  ;;  %v77_v8 = vld [vmem:[%s2213_s0 + $0x78] sm:$0xff]  ;;  %v1203_v9 = vld [vmem:[%s2212_s1 + $0x150] sm:$0xf]  ;;  %v1363_v13 = vld [vmem:[%s2212_s1 + $0x154] sm:$0xf]  ;;  %v1052_v17 = vor.u32 %v1324_v5, %v1049_v6 }
  0x13   :  { %668 = vmatpush.bf16.msra.mxu3 %v1088_v42  ;;  %v1364_v10 = vld [vmem:[%s2212_s1 + $0x158] sm:$0xf0]  ;;  %v1227_v14 = vld [vmem:[%s2212_s1 + $0x180] sm:$0xf]  ;;  %v1370_v15 = vld [vmem:[%s2212_s1 + $0x188] sm:$0xf0]  ;;  %v1614_v21 = vpack.c.bf16 %v77_v8, %v74_v3 }
  0x14   :  { %582 = vmatpush.bf16.msra.mxu0 %v1072_v37  ;;  %1397 = vmatpush.bf16.msra.mxu1 %v1072_v37  ;;  %v1205_v16 = vld [vmem:[%s2212_s1 + $0x15c] sm:$0xf0]  ;;  %v1321_v18 = vld [vmem:[%s2212_s1 + $0x4] sm:$0xf]  ;;  %v1037_v19 = vld [vmem:[%s2212_s1 + $0xc] sm:$0xf0]  ;;  %v1228_v25 = vor.u32 %v1370_v15, %v1227_v14  ;;  %v1204_v29 = vor.u32 %v1364_v10, %v1203_v9 }
  0x15   :  { %v64_v22 = vld [vmem:[%s2213_s0 + $0x10] sm:$0xff]  ;;  %v1344_v24 = vld [vmem:[%s2212_s1 + $0xb8] sm:$0xf0]  ;;  %v67_v26 = vld [vmem:[%s2213_s0 + $0x28] sm:$0xff]  ;;  %v1208_v30 = vor.u32 %v1363_v13, %v1205_v16  ;;  %v1040_v35 = vor.u32 %v1321_v18, %v1037_v19 }
  0x16   :  { %640 = vmatpush.bf16.msra.mxu2 %v1264_v45  ;;  %v1127_v23 = vld [vmem:[%s2212_s1 + $0xb0] sm:$0xf]  ;;  %v1368_v28 = vld [vmem:[%s2212_s1 + $0x178] sm:$0xf0]  ;;  %v1191_v31 = vld [vmem:[%s2212_s1 + $0x138] sm:$0xf]  ;;  %v1648_v37 = vpack.c.bf16 %v67_v26, %v64_v22 }
  0x17   :  { %669 = vmatpush.bf16.msra.mxu3 %v1076_v51  ;;  %v1223_v27 = vld [vmem:[%s2212_s1 + $0x170] sm:$0xf]  ;;  %v1361_v32 = vld [vmem:[%s2212_s1 + $0x140] sm:$0xf0]  ;;  %v1360_v33 = vld [vmem:[%s2212_s1 + $0x13c] sm:$0xf]  ;;  %v1128_v36 = vor.u32 %v1344_v24, %v1127_v23 }
  0x18   :  { %583 = vmatpush.bf16.msra.mxu0 %v1060_v46  ;;  %1398 = vmatpush.bf16.msra.mxu1 %v1060_v46  ;;  %v1193_v34 = vld [vmem:[%s2212_s1 + $0x144] sm:$0xf0]  ;;  %v1224_v38 = vor.u32 %v1368_v28, %v1223_v27  ;;  %v1115_v39 = vld [vmem:[%s2212_s1 + $0x98] sm:$0xf]  ;;  %v1341_v40 = vld [vmem:[%s2212_s1 + $0xa0] sm:$0xf0]  ;;  %v1192_v43 = vor.u32 %v1361_v32, %v1191_v31 }
  0x19   :  { %v1211_v41 = vld [vmem:[%s2212_s1 + $0x158] sm:$0xf]  ;;  %v1365_v42 = vld [vmem:[%s2212_s1 + $0x160] sm:$0xf0]  ;;  %v1196_v44 = vor.u32 %v1360_v33, %v1193_v34  ;;  %v1179_v45 = vld [vmem:[%s2212_s1 + $0x120] sm:$0xf]  ;;  %v1116_v49 = vor.u32 %v1341_v40, %v1115_v39 }
  0x1a   :  { %641 = vmatpush.bf16.msra.mxu2 %v1252_v54  ;;  %v1358_v46 = vld [vmem:[%s2212_s1 + $0x128] sm:$0xf0]  ;;  %v1357_v47 = vld [vmem:[%s2212_s1 + $0x124] sm:$0xf]  ;;  %v1181_v48 = vld [vmem:[%s2212_s1 + $0x12c] sm:$0xf0]  ;;  %v1212_v50 = vor.u32 %v1365_v42, %v1211_v41 }
  0x1b   :  { %670 = vmatpush.bf16.msra.mxu3 %v1064_v61  ;;  %v1103_v51 = vld [vmem:[%s2212_s1 + $0x80] sm:$0xf]  ;;  %v1338_v52 = vld [vmem:[%s2212_s1 + $0x88] sm:$0xf0]  ;;  %v1184_v56 = vor.u32 %v1357_v47, %v1181_v48  ;;  %v1167_v57 = vld [vmem:[%s2212_s1 + $0x108] sm:$0xf] }
  0x1c   :  { %584 = vmatpush.bf16.msra.mxu0 %v1048_v55  ;;  %1399 = vmatpush.bf16.msra.mxu1 %v1048_v55  ;;  %v1199_v53 = vld [vmem:[%s2212_s1 + $0x140] sm:$0xf]  ;;  %v1362_v54 = vld [vmem:[%s2212_s1 + $0x148] sm:$0xf0]  ;;  %v1180_v55 = vor.u32 %v1358_v46, %v1179_v45  ;;  %v1355_v58 = vld [vmem:[%s2212_s1 + $0x110] sm:$0xf0]  ;;  %v1104_v61 = vor.u32 %v1338_v52, %v1103_v51 }
  0x1d   :  { %v1354_v59 = vld [vmem:[%s2212_s1 + $0x10c] sm:$0xf]  ;;  %v1169_v60 = vld [vmem:[%s2212_s1 + $0x114] sm:$0xf0]  ;;  %v68_v62 = vld [vmem:[%s2213_s0 + $0x30] sm:$0xff]  ;;  %v1200_v63 = vor.u32 %v1362_v54, %v1199_v53  ;;  %v1168_v3 = vor.u32 %v1355_v58, %v1167_v57 }
  0x1e   :  { %642 = vmatpush.bf16.msra.mxu2 %v1240_v4  ;;  %v71_v0 = vld [vmem:[%s2213_s0 + $0x48] sm:$0xff]  ;;  %v80_v1 = vld [vmem:[%s2213_s0 + $0x90] sm:$0xff]  ;;  %v1172_v4 = vor.u32 %v1354_v59, %v1169_v60  ;;  %v1352_v6 = vld [vmem:[%s2212_s1 + $0xf8] sm:$0xf0] }
  0x1f   :  { %671 = vmatpush.bf16.msra.mxu3 %v1052_v17  ;;  %v83_v2 = vld [vmem:[%s2213_s0 + $0xa8] sm:$0xff]  ;;  %v1155_v5 = vld [vmem:[%s2212_s1 + $0xf0] sm:$0xf]  ;;  %v1157_v8 = vld [vmem:[%s2212_s1 + $0xfc] sm:$0xf0]  ;;  %v1724_v9 = vpack.c.bf16 %v71_v0, %v68_v62 }
  0x20   :  { %585 = vmatpush.bf16.msra.mxu0 %v1036_v7  ;;  %1400 = vmatpush.bf16.msra.mxu1 %v1036_v7  ;;  %v1351_v7 = vld [vmem:[%s2212_s1 + $0xf4] sm:$0xf]  ;;  %v1726_v10 = vpack.c.bf16 %v83_v2, %v80_v1  ;;  %v1156_v13 = vor.u32 %v1352_v6, %v1155_v5  ;;  %v1143_v15 = vld [vmem:[%s2212_s1 + $0xd8] sm:$0xf]  ;;  %v1349_v16 = vld [vmem:[%s2212_s1 + $0xe0] sm:$0xf0] }
  0x21   :  { %v1160_v14 = vor.u32 %v1351_v7, %v1157_v8  ;;  %v1348_v17 = vld [vmem:[%s2212_s1 + $0xdc] sm:$0xf]  ;;  %v1145_v18 = vld [vmem:[%s2212_s1 + $0xe4] sm:$0xf0]  ;;  %v1144_v23 = vor.u32 %v1349_v16, %v1143_v15  ;;  %v1131_v24 = vld [vmem:[%s2212_s1 + $0xc0] sm:$0xf] }
  0x22   :  { %643 = vmatpush.bf16.msra.mxu2 %v1228_v25  ;;  %v1091_v22 = vld [vmem:[%s2212_s1 + $0x68] sm:$0xf]  ;;  %v1346_v25 = vld [vmem:[%s2212_s1 + $0xc8] sm:$0xf0]  ;;  %v1345_v26 = vld [vmem:[%s2212_s1 + $0xc4] sm:$0xf] }
  0x23   :  { %586 = vmatmul.bf16.vlgmr.msra.gmra.mxu0 %v1612_v20  ;;  %596 = vmatmul.bf16.vlgmr.msra.gmra.mxu1 %v1614_v21  ;;  %v1335_v27 = vld [vmem:[%s2212_s1 + $0x70] sm:$0xf0]  ;;  %v1187_v28 = vld [vmem:[%s2212_s1 + $0x128] sm:$0xf]  ;;  %v1133_v31 = vld [vmem:[%s2212_s1 + $0xcc] sm:$0xf0]  ;;  %v1132_v45 = vor.u32 %v1346_v25, %v1131_v24 }
  0x24   :  { %607 = vmatpush.bf16.msrb.mxu1 %v1216_v11  ;;  %694 = vmatpush.bf16.msrb.mxu0 %v1220_v12  ;;  %v70_v11 = vld [vmem:[%s2213_s0 + $0x40] sm:$0xff]  ;;  %v73_v12 = vld [vmem:[%s2213_s0 + $0x58] sm:$0xff]  ;;  %v1390_v32 = vld [vmem:[%s2212_s1 + $0x22c] sm:$0xf]  ;;  %v1092_v34 = vor.u32 %v1335_v27, %v1091_v22  ;;  %v1136_v46 = vor.u32 %v1345_v26, %v1133_v31 }
  0x25   :  { %672 = vmatpush.bf16.msra.mxu3 %v1040_v35  ;;  %644 = vmatmul.bf16.vlgmr.msra.gmra.mxu2 %v1648_v37  ;;  %v1748_v19 = vpack.c.bf16 %v73_v12, %v70_v11  ;;  %v1313_v33 = vld [vmem:[%s2212_s1 + $0x234] sm:$0xf0]  ;;  %v1332_v39 = vld [vmem:[%s2212_s1 + $0x58] sm:$0xf0]  ;;  %v1175_v41 = vld [vmem:[%s2212_s1 + $0x110] sm:$0xf] }
  0x26   :  { %752 = vmatpush.bf16.msrb.mxu2 %v1128_v36  ;;  %v1319_v36 = vld [vmem:[%s2212_s1 + $0x230] sm:$0xf]  ;;  %v1392_v40 = vld [vmem:[%s2212_s1 + $0x238] sm:$0xf0]  ;;  %v1316_v47 = vor.u32 %v1390_v32, %v1313_v33  ;;  %v1307_v51 = vld [vmem:[%s2212_s1 + $0x218] sm:$0xf] }
  0x27   :  { %v1356_v42 = vld [vmem:[%s2212_s1 + $0x118] sm:$0xf0]  ;;  %v1320_v48 = vor.u32 %v1392_v40, %v1319_v36  ;;  %v1389_v52 = vld [vmem:[%s2212_s1 + $0x220] sm:$0xf0]  ;;  %v63_v53 = vld [vmem:[%s2213_s0 + $0x8] sm:$0xff] }
  0x28   :  { %608 = vmatpush.bf16.msrb.mxu1 %v1204_v29  ;;  %695 = vmatpush.bf16.msrb.mxu0 %v1208_v30  ;;  %v1359_v29 = vld [vmem:[%s2212_s1 + $0x130] sm:$0xf0]  ;;  %v1148_v30 = vor.u32 %v1348_v17, %v1145_v18  ;;  %v66_v54 = vld [vmem:[%s2213_s0 + $0x20] sm:$0xff]  ;;  %v1384_v57 = vld [vmem:[%s2212_s1 + $0x1fc] sm:$0xf] }
  0x29   :  { %781 = vmatpush.bf16.msrb.mxu3 %v1224_v38  ;;  %v1188_v35 = vor.u32 %v1359_v29, %v1187_v28  ;;  %v1079_v38 = vld [vmem:[%s2212_s1 + $0x50] sm:$0xf]  ;;  %v1821_v58 = vpack.c.bf16 %v66_v54, %v63_v53  ;;  %v1289_v59 = vld [vmem:[%s2212_s1 + $0x204] sm:$0xf0]  ;;  %v1295_v60 = vld [vmem:[%s2212_s1 + $0x200] sm:$0xf] }
  0x2a   :  { %673 = vmatmul.bf16.vlgmr.msra.gmra.mxu3 %v1612_v20  ;;  %753 = vmatpush.bf16.msrb.mxu2 %v1116_v49  ;;  %v1387_v49 = vld [vmem:[%s2212_s1 + $0x214] sm:$0xf]  ;;  %v1292_v0 = vor.u32 %v1384_v57, %v1289_v59  ;;  %v1381_v2 = vld [vmem:[%s2212_s1 + $0x1e4] sm:$0xf]  ;;  %v1283_v5 = vld [vmem:[%s2212_s1 + $0x1e8] sm:$0xf] }
  0x2b   :  { %v76_v62 = vld [vmem:[%s2213_s0 + $0x70] sm:$0xff]  ;;  %v1067_v7 = vld [vmem:[%s2212_s1 + $0x38] sm:$0xf]  ;;  %v1329_v8 = vld [vmem:[%s2212_s1 + $0x40] sm:$0xf0] }
  0x2c   :  { %609 = vmatpush.bf16.msrb.mxu1 %v1192_v43  ;;  %696 = vmatpush.bf16.msrb.mxu0 %v1196_v44  ;;  %v1080_v43 = vor.u32 %v1332_v39, %v1079_v38  ;;  %v1176_v44 = vor.u32 %v1356_v42, %v1175_v41  ;;  %v1383_v6 = vld [vmem:[%s2212_s1 + $0x1f0] sm:$0xf0]  ;;  %v1163_v11 = vld [vmem:[%s2212_s1 + $0xf8] sm:$0xf]  ;;  %v1353_v12 = vld [vmem:[%s2212_s1 + $0x100] sm:$0xf0] }
  0x2d   :  { %782 = vmatpush.bf16.msrb.mxu3 %v1212_v50  ;;  %v1301_v50 = vld [vmem:[%s2212_s1 + $0x21c] sm:$0xf0]  ;;  %v1378_v16 = vld [vmem:[%s2212_s1 + $0x1cc] sm:$0xf]  ;;  %v1284_v22 = vor.u32 %v1383_v6, %v1283_v5  ;;  %v1271_v26 = vld [vmem:[%s2212_s1 + $0x1d0] sm:$0xf] }
  0x2e   :  { %754 = vmatpush.bf16.msrb.mxu2 %v1104_v61  ;;  %v1386_v61 = vld [vmem:[%s2212_s1 + $0x208] sm:$0xf0]  ;;  %v1055_v17 = vld [vmem:[%s2212_s1 + $0x20] sm:$0xf]  ;;  %v1380_v27 = vld [vmem:[%s2212_s1 + $0x1d8] sm:$0xf0] }
  0x2f   :  { %v1296_v1 = vor.u32 %v1386_v61, %v1295_v60  ;;  %v1326_v18 = vld [vmem:[%s2212_s1 + $0x28] sm:$0xf0]  ;;  %v1151_v24 = vld [vmem:[%s2212_s1 + $0xe0] sm:$0xf]  ;;  %v1323_v31 = vld [vmem:[%s2212_s1 + $0x10] sm:$0xf0] }
  0x30   :  { %610 = vmatpush.bf16.msrb.mxu1 %v1180_v55  ;;  %697 = vmatpush.bf16.msrb.mxu0 %v1184_v56  ;;  %v1304_v55 = vor.u32 %v1387_v49, %v1301_v50  ;;  %v1308_v56 = vor.u32 %v1389_v52, %v1307_v51  ;;  %v1350_v25 = vld [vmem:[%s2212_s1 + $0xe8] sm:$0xf0]  ;;  %v1056_v28 = vor.u32 %v1326_v18, %v1055_v17  ;;  %v1139_v32 = vld [vmem:[%s2212_s1 + $0xc8] sm:$0xf]  ;;  %v1347_v33 = vld [vmem:[%s2212_s1 + $0xd0] sm:$0xf0] }
  0x31   :  { %783 = vmatpush.bf16.msrb.mxu3 %v1200_v63  ;;  %v79_v63 = vld [vmem:[%s2213_s0 + $0x88] sm:$0xff]  ;;  %v1152_v29 = vor.u32 %v1350_v25, %v1151_v24  ;;  %v1375_v36 = vld [vmem:[%s2212_s1 + $0x1b4] sm:$0xf]  ;;  %v1253_v38 = vld [vmem:[%s2212_s1 + $0x1bc] sm:$0xf0]  ;;  %v1140_v39 = vor.u32 %v1347_v33, %v1139_v32 }
  0x32   :  { %755 = vmatpush.bf16.msrb.mxu2 %v1092_v34  ;;  %v69_v40 = vld [vmem:[%s2213_s0 + $0x38] sm:$0xff]  ;;  %v72_v41 = vld [vmem:[%s2213_s0 + $0x50] sm:$0xff]  ;;  %v1241_v52 = vld [vmem:[%s2212_s1 + $0x1a4] sm:$0xf0] }
  0x33   :  { %591 = vmatmul.bf16.gmra.mxu0 %v1724_v9  ;;  %601 = vmatmul.bf16.gmra.mxu1 %v1726_v10  ;;  %v1372_v51 = vld [vmem:[%s2212_s1 + $0x19c] sm:$0xf]  ;;  %v1247_v53 = vld [vmem:[%s2212_s1 + $0x1a0] sm:$0xf]  ;;  %v1229_v57 = vld [vmem:[%s2212_s1 + $0x18c] sm:$0xf0] }
  0x34   :  { %611 = vmatpush.bf16.msrb.mxu1 %v1168_v3  ;;  %698 = vmatpush.bf16.msrb.mxu0 %v1172_v4  ;;  %v1277_v3 = vld [vmem:[%s2212_s1 + $0x1ec] sm:$0xf0]  ;;  %v1846_v4 = vpack.c.bf16 %v79_v63, %v76_v62  ;;  %v1244_v54 = vor.u32 %v1372_v51, %v1241_v52  ;;  %v1235_v60 = vld [vmem:[%s2212_s1 + $0x188] sm:$0xf]  ;;  %v1371_v61 = vld [vmem:[%s2212_s1 + $0x190] sm:$0xf0] }
  0x35   :  { %649 = vmatmul.bf16.gmra.mxu2 %v1748_v19  ;;  %784 = vmatpush.bf16.msrb.mxu3 %v1188_v35  ;;  %v1280_v15 = vor.u32 %v1381_v2, %v1277_v3  ;;  %v1272_v35 = vor.u32 %v1380_v27, %v1271_v26  ;;  %v1236_v63 = vor.u32 %v1371_v61, %v1235_v60  ;;  %v81_v3 = vld [vmem:[%s2213_s0 + $0x98] sm:$0xff]  ;;  %v84_v5 = vld [vmem:[%s2213_s0 + $0xb0] sm:$0xff] }
  0x36   :  { %756 = vmatpush.bf16.msrb.mxu2 %v1080_v43  ;;  %v1259_v43 = vld [vmem:[%s2212_s1 + $0x1b8] sm:$0xf]  ;;  %v96_v6 = vpack.c.bf16 %v84_v5, %v81_v3 }
  0x37   :  { %v917_v60 = vld [vmem:[%s2214_s3 + $0x38] sm:$0xff] }
  0x38   :  { %612 = vmatpush.bf16.msrb.mxu1 %v1156_v13  ;;  %699 = vmatpush.bf16.msrb.mxu0 %v1160_v14  ;;  %v1068_v13 = vor.u32 %v1329_v8, %v1067_v7  ;;  %v1164_v14 = vor.u32 %v1353_v12, %v1163_v11 }
  0x39   :  { %785 = vmatpush.bf16.msrb.mxu3 %v1176_v44  ;;  %v1377_v44 = vld [vmem:[%s2212_s1 + $0x1c0] sm:$0xf0] }
  0x3a   :  { %678 = vmatmul.bf16.gmra.mxu3 %v1724_v9  ;;  %757 = vmatpush.bf16.msrb.mxu2 %v1068_v13  ;;  %v1260_v49 = vor.u32 %v1377_v44, %v1259_v43 }
  0x3c   :  { %613 = vmatpush.bf16.msrb.mxu1 %v1144_v23  ;;  %700 = vmatpush.bf16.msrb.mxu0 %v1148_v30  ;;  %v1265_v23 = vld [vmem:[%s2212_s1 + $0x1d4] sm:$0xf0]  ;;  %v1043_v30 = vld [vmem:[%s2212_s1 + $0x8] sm:$0xf] }
  0x3d   :  { %786 = vmatpush.bf16.msrb.mxu3 %v1164_v14  ;;  %v1268_v34 = vor.u32 %v1378_v16, %v1265_v23  ;;  %v1044_v42 = vor.u32 %v1323_v31, %v1043_v30 }
  0x3e   :  { %758 = vmatpush.bf16.msrb.mxu2 %v1056_v28 }
  0x40   :  { %614 = vmatpush.bf16.msrb.mxu1 %v1132_v45  ;;  %701 = vmatpush.bf16.msrb.mxu0 %v1136_v46  ;;  %v1256_v45 = vor.u32 %v1375_v36, %v1253_v38  ;;  %v90_v46 = vpack.c.bf16 %v72_v41, %v69_v40  ;;  %v925_v36 = vld [vmem:[%s2214_s3 + $0x78] sm:$0xff]  ;;  %v924_v40 = vld [vmem:[%s2214_s3 + $0x70] sm:$0xff]  ;;  %v923_v41 = vld [vmem:[%s2214_s3 + $0x68] sm:$0xff] }
  0x41   :  { %787 = vmatpush.bf16.msrb.mxu3 %v1152_v29 }
  0x42   :  { %759 = vmatpush.bf16.msrb.mxu2 %v1044_v42 }
  0x43   :  { %615 = vmatmul.bf16.vlgmr.msrb.gmra.mxu1 %v1821_v58  ;;  %702 = vmatmul.bf16.vlgmr.msrb.gmra.mxu0 %v1821_v58 }
  0x44   :  { %723 = vmatpush.bf16.msra.mxu1 %v1316_v47  ;;  %810 = vmatpush.bf16.msra.mxu0 %v1320_v48  ;;  %v82_v47 = vld [vmem:[%s2213_s0 + $0xa0] sm:$0xff]  ;;  %v85_v48 = vld [vmem:[%s2213_s0 + $0xb8] sm:$0xff] }
  0x45   :  { %654 = vmatmul.bf16.gmra.mxu2 %v1846_v4  ;;  %788 = vmatpush.bf16.msrb.mxu3 %v1140_v39  ;;  %v97_v50 = vpack.c.bf16 %v85_v48, %v82_v47  ;;  %v921_v47 = vld [vmem:[%s2214_s3 + $0x58] sm:$0xff] }
  0x48   :  { %724 = vmatpush.bf16.msra.mxu1 %v1304_v55  ;;  %811 = vmatpush.bf16.msra.mxu0 %v1308_v56  ;;  %v1374_v55 = vld [vmem:[%s2212_s1 + $0x1a8] sm:$0xf0]  ;;  %v1369_v56 = vld [vmem:[%s2212_s1 + $0x184] sm:$0xf] }
  0x49   :  { %v1248_v59 = vor.u32 %v1374_v55, %v1247_v53  ;;  %v1232_v62 = vor.u32 %v1369_v56, %v1229_v57  ;;  %v918_v55 = vld [vmem:[%s2214_s3 + $0x40] sm:$0xff] }
  0x4a   :  { %683 = vmatmul.bf16.gmra.mxu3 %v1614_v21 }
  0x4c   :  { %725 = vmatpush.bf16.msra.mxu1 %v1292_v0  ;;  %812 = vmatpush.bf16.msra.mxu0 %v1296_v1  ;;  %v75_v0 = vld [vmem:[%s2213_s0 + $0x68] sm:$0xff]  ;;  %v78_v1 = vld [vmem:[%s2213_s0 + $0x80] sm:$0xff] }
  0x4d   :  { %v93_v2 = vpack.c.bf16 %v78_v1, %v75_v0  ;;  %v916_v0 = vld [vmem:[%s2214_s3 + $0x30] sm:$0xff] }
  0x50   :  { %726 = vmatpush.bf16.msra.mxu1 %v1280_v15  ;;  %813 = vmatpush.bf16.msra.mxu0 %v1284_v22 }
  0x53   :  { %620 = vmatmul.bf16.gmra.mxu1 %v90_v46  ;;  %707 = vmatmul.bf16.gmra.mxu0 %v90_v46 }
  0x54   :  { %727 = vmatpush.bf16.msra.mxu1 %v1268_v34  ;;  %814 = vmatpush.bf16.msra.mxu0 %v1272_v35 }
  0x55   :  { %659 = vmatmul.bf16.gmra.mxu2 %v97_v50 }
  0x58   :  { %728 = vmatpush.bf16.msra.mxu1 %v1256_v45  ;;  %815 = vmatpush.bf16.msra.mxu0 %v1260_v49  ;;  %v922_v45 = vld [vmem:[%s2214_s3 + $0x60] sm:$0xff]  ;;  %v920_v49 = vld [vmem:[%s2214_s3 + $0x50] sm:$0xff] }
  0x5a   :  { %688 = vmatmul.bf16.gmra.mxu3 %v1726_v10 }
  0x5c   :  { %729 = vmatpush.bf16.msra.mxu1 %v1244_v54  ;;  %816 = vmatpush.bf16.msra.mxu0 %v1248_v59 }
  0x60   :  { %730 = vmatpush.bf16.msra.mxu1 %v1232_v62  ;;  %817 = vmatpush.bf16.msra.mxu0 %v1236_v63 }
  0x63   :  { %625 = vmatmul.bf16.gmra.mxu1 %v93_v2  ;;  %712 = vmatmul.bf16.gmra.mxu0 %v93_v2 }
  0x64   :  { %962 = vmatpush.msrb.mxu1 %v925_v36  ;;  %v939_v36 = vld [vmem:[%s2214_s3 + $0xe8] sm:$0xff] }
  0x65   :  { %760 = vmatmul.bf16.vlgmr.msrb.gmra.mxu2 %v1612_v20 }
  0x66   :  { %963 = vmatpush.msrb.mxu1 %v924_v40  ;;  %v954_v40 = vld [vmem:[%s2214_s3 + $0x160] sm:$0xff] }
  0x68   :  { %964 = vmatpush.msrb.mxu1 %v923_v41 }
  0x6a   :  { %789 = vmatmul.bf16.vlgmr.msrb.gmra.mxu3 %v1821_v58  ;;  %965 = vmatpush.msrb.mxu1 %v922_v45 }
  0x6c   :  { %966 = vmatpush.msrb.mxu1 %v921_v47 }
  0x6e   :  { %967 = vmatpush.msrb.mxu1 %v920_v49  ;;  %v937_v49 = vld [vmem:[%s2214_s3 + $0xd8] sm:$0xff] }
  0x73   :  { %630 = vmatmul.bf16.gmra.mxu1 %v96_v6  ;;  %717 = vmatmul.bf16.gmra.mxu0 %v96_v6 }
  0x75   :  { %765 = vmatmul.bf16.gmra.mxu2 %v1724_v9 }
  0x7a   :  { %794 = vmatmul.bf16.gmra.mxu3 %v90_v46 }
  0x83   :  { %731 = vmatmul.bf16.vlgmr.msra.gmra.mxu1 %v1648_v37  ;;  %818 = vmatmul.bf16.vlgmr.msra.gmra.mxu0 %v1648_v37 }
  0x85   :  { %770 = vmatmul.bf16.gmra.mxu2 %v1614_v21 }
  0x8a   :  { %799 = vmatmul.bf16.gmra.mxu3 %v93_v2  ;;  %v915_v2 = vld [vmem:[%s2214_s3 + $0x28] sm:$0xff] }
  0x93   :  { %736 = vmatmul.bf16.gmra.mxu1 %v1748_v19  ;;  %823 = vmatmul.bf16.gmra.mxu0 %v1748_v19 }
  0x95   :  { %775 = vmatmul.bf16.gmra.mxu2 %v1726_v10 }
  0x9a   :  { %804 = vmatmul.bf16.gmra.mxu3 %v96_v6 }
  0xa0   :  { %v587_v20 = vpop.f32.mrf.mxu0  ;;  %v597_v58 = vpop.f32.mrf.mxu1 }
  0xa3   :  { %741 = vmatmul.bf16.gmra.mxu1 %v1846_v4  ;;  %828 = vmatmul.bf16.gmra.mxu0 %v1846_v4 }
  0xa8   :  { %v1976_v9 = vpop.f32.mrf.mxu0  ;;  %v1978_v7 = vpop.f32.mrf.mxu1 }
  0xa9   :  { %v645_v37 = vpop.f32.mrf.mxu2 }
  0xad   :  { %v674_v21 = vpop.f32.mrf.mxu3 }
  0xb0   :  { %v592_v8 = vpop.f32.mrf.mxu0  ;;  %v1980_v11 = vpop.f32.mrf.mxu1 }
  0xb1   :  { %v1982_v12 = vpop.f32.mrf.mxu2 }
  0xb3   :  { %746 = vmatmul.bf16.gmra.mxu1 %v97_v50  ;;  %833 = vmatmul.bf16.gmra.mxu0 %v97_v50  ;;  %v919_v50 = vld [vmem:[%s2214_s3 + $0x48] sm:$0xff] }
  0xb4   :  { %968 = vmatpush.msrb.mxu1 %v919_v50  ;;  %v953_v50 = vld [vmem:[%s2214_s3 + $0x158] sm:$0xff] }
  0xb5   :  { %v676_v10 = vpop.f32.mrf.mxu3 }
  0xb6   :  { %969 = vmatpush.msrb.mxu1 %v918_v55  ;;  %v2110_v55 = vld [vmem:[%s2216_s2] sm:$0x7] }
  0xb8   :  { %v594_v19 = vpop.f32.mrf.mxu0  ;;  %v1984_v13 = vpop.f32.mrf.mxu1  ;;  %970 = vmatpush.msrb.mxu1 %v917_v60 }
  0xb9   :  { %v650_v14 = vpop.f32.mrf.mxu2 }
  0xba   :  { %971 = vmatpush.msrb.mxu1 %v916_v0 }
  0xbc   :  { %972 = vmatpush.msrb.mxu1 %v915_v2  ;;  %v935_v2 = vld [vmem:[%s2214_s3 + $0xc8] sm:$0xff] }
  0xbd   :  { %v679_v15 = vpop.f32.mrf.mxu3 }
  0xc0   :  { %v616_v4 = vpop.f32.mrf.mxu1  ;;  %v703_v16 = vpop.f32.mrf.mxu0 }
  0xc1   :  { %v1986_v17 = vadd.f32 %v703_v16, %v674_v21  ;;  %v652_v18 = vpop.f32.mrf.mxu2  ;;  %v617_v28 = vadd.f32 %v616_v4, %v587_v20 }
  0xc3   :  { %v646_v34 = vadd.f32 %v645_v37, %v617_v28  ;;  %v913_v37 = vld [vmem:[%s2214_s3 + $0x18] sm:$0xff] }
  0xc5   :  { %v681_v22 = vpop.f32.mrf.mxu3 }
  0xc8   :  { %v618_v23 = vpop.f32.mrf.mxu1  ;;  %v705_v24 = vpop.f32.mrf.mxu0 }
  0xc9   :  { %v1988_v25 = vadd.f32 %v705_v24, %v676_v10  ;;  %v655_v26 = vpop.f32.mrf.mxu2  ;;  %v619_v61 = vadd.f32 %v618_v23, %v1976_v9  ;;  %v914_v9 = vld [vmem:[%s2214_s3 + $0x20] sm:$0xff]  ;;  %v912_v10 = vld [vmem:[%s2214_s3 + $0x10] sm:$0xff]  ;;  %v941_v24 = vld [vmem:[%s2214_s3 + $0xf8] sm:$0xff] }
  0xca   :  { %973 = vmatpush.msrb.mxu1 %v914_v9  ;;  %982 = vmatpush.msra.mxu2 %v941_v24 }
  0xcb   :  { %v648_v6 = vadd.f32 %v1982_v12, %v619_v61  ;;  %v895_v61 = vperm.slane %v2110_v55, 0 }
  0xcc   :  { %974 = vmatpush.msrb.mxu1 %v913_v37 }
  0xcd   :  { %v684_v27 = vpop.f32.mrf.mxu3 }
  0xce   :  { %975 = vmatpush.msrb.mxu1 %v912_v10 }
  0xd0   :  { %v621_v29 = vpop.f32.mrf.mxu1  ;;  %v708_v30 = vpop.f32.mrf.mxu0 }
  0xd1   :  { %v622_v31 = vadd.f32 %v621_v29, %v592_v8  ;;  %v1990_v32 = vadd.f32 %v708_v30, %v679_v15  ;;  %v657_v33 = vpop.f32.mrf.mxu2 }
  0xd3   :  { %v651_v35 = vadd.f32 %v650_v14, %v622_v31  ;;  %v911_v14 = vld [vmem:[%s2214_s3 + $0x8] sm:$0xff] }
  0xd4   :  { %976 = vmatpush.msrb.mxu1 %v911_v14 }
  0xd5   :  { %v839_v38 = vmax.f32 %v646_v34, %v651_v35  ;;  %v686_v39 = vpop.f32.mrf.mxu3 }
  0xd8   :  { %v623_v42 = vpop.f32.mrf.mxu1  ;;  %v710_v43 = vpop.f32.mrf.mxu0 }
  0xd9   :  { %v2001_v44 = vadd.f32 %v710_v43, %v681_v22  ;;  %v660_v46 = vpop.f32.mrf.mxu2  ;;  %v624_v56 = vadd.f32 %v623_v42, %v594_v19  ;;  %v910_v22 = vld [vmem:[%s2214_s3] sm:$0xff] }
  0xda   :  { %977 = vmatpush.msrb.mxu1 %v910_v22 }
  0xdb   :  { %v653_v1 = vadd.f32 %v652_v18, %v624_v56 }
  0xdd   :  { %v689_v48 = vpop.f32.mrf.mxu3  ;;  %v840_v21 = vmax.f32 %v648_v6, %v653_v1  ;;  %v950_v6 = vld [vmem:[%s2214_s3 + $0x140] sm:$0xff] }
  0xe0   :  { %v626_v51 = vpop.f32.mrf.mxu1  ;;  %v713_v52 = vpop.f32.mrf.mxu0 }
  0xe1   :  { %v627_v53 = vadd.f32 %v626_v51, %v597_v58  ;;  %v2015_v54 = vadd.f32 %v713_v52, %v684_v27  ;;  %v662_v59 = vpop.f32.mrf.mxu2  ;;  %v956_v27 = vld [vmem:[%s2214_s3 + $0x170] sm:$0xff] }
  0xe2   :  { %v936_v51 = vld [vmem:[%s2214_s3 + $0xd0] sm:$0xff] }
  0xe3   :  { %v656_v57 = vadd.f32 %v655_v26, %v627_v53  ;;  %v957_v26 = vld [vmem:[%s2214_s3 + $0x178] sm:$0xff]  ;;  %v952_v52 = vld [vmem:[%s2214_s3 + $0x150] sm:$0xff] }
  0xe4   :  { %1002 = vmatpush.msra.mxu3 %v957_v26 }
  0xe5   :  { %v841_v62 = vmax.f32 %v839_v38, %v656_v57  ;;  %v2024_v63 = vpop.f32.mrf.mxu3  ;;  %v955_v38 = vld [vmem:[%s2214_s3 + $0x168] sm:$0xff] }
  0xe6   :  { %1003 = vmatpush.msra.mxu3 %v956_v27 }
  0xe8   :  { %v628_v3 = vpop.f32.mrf.mxu1  ;;  %v715_v5 = vpop.f32.mrf.mxu0  ;;  %1004 = vmatpush.msra.mxu3 %v955_v38 }
  0xe9   :  { %v629_v20 = vadd.f32 %v628_v3, %v1978_v7  ;;  %v2034_v58 = vadd.f32 %v715_v5, %v686_v39  ;;  %v2045_v7 = vpop.f32.mrf.mxu2  ;;  %v938_v39 = vld [vmem:[%s2214_s3 + $0xe0] sm:$0xff]  ;;  %v951_v3 = vld [vmem:[%s2214_s3 + $0x148] sm:$0xff] }
  0xea   :  { %1005 = vmatpush.msra.mxu3 %v954_v40  ;;  %v934_v5 = vld [vmem:[%s2214_s3 + $0xc0] sm:$0xff]  ;;  %v947_v40 = vld [vmem:[%s2214_s3 + $0x128] sm:$0xff] }
  0xeb   :  { %v658_v8 = vadd.f32 %v657_v33, %v629_v20 }
  0xec   :  { %1006 = vmatpush.msra.mxu3 %v953_v50 }
  0xed   :  { %v842_v12 = vmax.f32 %v840_v21, %v658_v8  ;;  %v2047_v19 = vpop.f32.mrf.mxu3 }
  0xee   :  { %1007 = vmatpush.msra.mxu3 %v952_v52 }
  0xf0   :  { %v631_v15 = vpop.f32.mrf.mxu1  ;;  %v718_v4 = vpop.f32.mrf.mxu0  ;;  %1008 = vmatpush.msra.mxu3 %v951_v3 }
  0xf1   :  { %v632_v16 = vadd.f32 %v631_v15, %v1980_v11  ;;  %v2053_v18 = vadd.f32 %v718_v4, %v689_v48  ;;  %v940_v11 = vld [vmem:[%s2214_s3 + $0xf0] sm:$0xff]  ;;  %v2070_v29 = vpop.f32.mrf.mxu2  ;;  %v933_v15 = vld [vmem:[%s2214_s3 + $0xb8] sm:$0xff] }
  0xf2   :  { %983 = vmatpush.msra.mxu2 %v940_v11  ;;  %1009 = vmatpush.msra.mxu3 %v950_v6  ;;  %v949_v4 = vld [vmem:[%s2214_s3 + $0x138] sm:$0xff] }
  0xf3   :  { %v661_v23 = vadd.f32 %v660_v46, %v632_v16  ;;  %v932_v16 = vld [vmem:[%s2214_s3 + $0xb0] sm:$0xff] }
  0xf4   :  { %984 = vmatpush.msra.mxu2 %v939_v36  ;;  %1010 = vmatpush.msra.mxu3 %v949_v4 }
  0xf5   :  { %v843_v28 = vmax.f32 %v841_v62, %v661_v23  ;;  %v2072_v30 = vpop.f32.mrf.mxu3 }
  0xf6   :  { %985 = vmatpush.msra.mxu2 %v938_v39  ;;  %v931_v39 = vld [vmem:[%s2214_s3 + $0xa8] sm:$0xff] }
  0xf8   :  { %v633_v31 = vpop.f32.mrf.mxu1  ;;  %v2074_v33 = vpop.f32.mrf.mxu0  ;;  %986 = vmatpush.msra.mxu2 %v937_v49  ;;  %v944_v49 = vld [vmem:[%s2214_s3 + $0x110] sm:$0xff] }
  0xf9   :  { %v634_v34 = vadd.f32 %v633_v31, %v1984_v13  ;;  %v2091_v46 = vpop.f32.mrf.mxu2 }
  0xfa   :  { %987 = vmatpush.msra.mxu2 %v936_v51 }
  0xfb   :  { %v663_v35 = vadd.f32 %v662_v59, %v634_v34 }
  0xfc   :  { %988 = vmatpush.msra.mxu2 %v935_v2  ;;  %v791_v2 = vadd.f32 %v2047_v19, %v2045_v7 }
  0xfd   :  { %v844_v13 = vmax.f32 %v842_v12, %v663_v35  ;;  %v2093_v47 = vpop.f32.mrf.mxu3 }
  0xfe   :  { %989 = vmatpush.msra.mxu2 %v934_v5 }
  0xff   :  { %v845_v41 = vmax.f32 %v843_v28, %v844_v13 }
 0x100   :  { %v732_v42 = vpop.f32.mrf.mxu1  ;;  %v2089_v43 = vpop.f32.mrf.mxu0  ;;  %990 = vmatpush.msra.mxu2 %v933_v15 }
 0x101   :  { %v875_v45 = vrot.slane %v845_v41, 4  ;;  %v2115_v62 = vpop.f32.mrf.mxu2  ;;  %v733_v8 = vadd.f32 %v732_v42, %v1986_v17  ;;  %v948_v17 = vld [vmem:[%s2214_s3 + $0x130] sm:$0xff]  ;;  %v945_v42 = vld [vmem:[%s2214_s3 + $0x118] sm:$0xff]  ;;  %v820_v7 = vadd.f32 %v2089_v43, %v791_v2 }
 0x102   :  { %991 = vmatpush.msra.mxu2 %v932_v16  ;;  %1011 = vmatpush.msra.mxu3 %v948_v17 }
 0x103   :  { %v876_v48 = vmax.f32 %v845_v41, %v875_v45 }
 0x104   :  { %992 = vmatpush.msra.mxu2 %v931_v39  ;;  %1012 = vmatpush.msra.mxu3 %v947_v40  ;;  %v896_v39 = vperm.slane %v2110_v55, 1  ;;  %v897_v40 = vperm.slane %v2110_v55, 2 }
 0x105   :  { %v877_v53 = vrot.slane %v876_v48, 2  ;;  %v2117_v0 = vpop.f32.mrf.mxu3 }
 0x106   :  { %v798_v3 = vadd.f32 %v2117_v0, %v2115_v62 }
 0x107   :  { %v878_v56 = vmax.f32 %v876_v48, %v877_v53  ;;  %v928_v48 = vld [vmem:[%s2214_s3 + $0x90] sm:$0xff]  ;;  %v927_v53 = vld [vmem:[%s2214_s3 + $0x88] sm:$0xff] }
 0x108   :  { %v734_v57 = vpop.f32.mrf.mxu1  ;;  %v2112_v59 = vpop.f32.mrf.mxu0 }
 0x109   :  { %v879_v60 = vrot.slane %v878_v56, 1  ;;  %v735_v26 = vadd.f32 %v734_v57, %v1988_v25  ;;  %v930_v25 = vld [vmem:[%s2214_s3 + $0xa0] sm:$0xff] }
 0x10a   :  { %993 = vmatpush.msra.mxu2 %v930_v25  ;;  %v942_v57 = vld [vmem:[%s2214_s3 + $0x100] sm:$0xff] }
 0x10b   :  { %v880_v1 = vmax.f32 %v878_v56, %v879_v60  ;;  %v926_v56 = vld [vmem:[%s2214_s3 + $0x80] sm:$0xff]  ;;  %v796_v60 = vadd.f32 %v2093_v47, %v2091_v46 }
 0x10d   :  { %v901_v20 = vadd.f32 %v895_v61, %v880_v1  ;;  %v800_v22 = vpop.f32.mrf.mxu3 }
 0x10f   :  { %v904_v9 = vmax.f32 %v901_v20, 0.0  ;;  %v793_v20 = vadd.f32 %v2072_v30, %v2070_v29 }
 0x110   :  { %v737_v37 = vpop.f32.mrf.mxu1  ;;  %v2131_v21 = vpop.f32.mrf.mxu0 }
 0x111   :  { %v738_v10 = vadd.f32 %v737_v37, %v1990_v32  ;;  %v907_v12 = vperm.slane %v904_v9, 0  ;;  %v771_v32 = vpop.f32.mrf.mxu2  ;;  %v825_v46 = vadd.f32 %v2131_v21, %v796_v60  ;;  %v822_v19 = vadd.f32 %v2112_v59, %v793_v20 }
 0x112   :  { %v801_v5 = vadd.f32 %v800_v22, %v771_v32 }
 0x113   :  { %v846_v14 = vmax.f32 %v733_v8, %v738_v10  ;;  %978 = vmatmul.f32.vlgmr.msrb.gmra.mxu1 %v907_v12 }
 0x115   :  { %v802_v31 = vpop.f32.mrf.mxu3 }
 0x118   :  { %v739_v23 = vpop.f32.mrf.mxu1  ;;  %v826_v24 = vpop.f32.mrf.mxu0 }
 0x119   :  { %v740_v11 = vadd.f32 %v739_v23, %v2001_v44  ;;  %v773_v28 = vpop.f32.mrf.mxu2  ;;  %v946_v44 = vld [vmem:[%s2214_s3 + $0x120] sm:$0xff]  ;;  %v827_v47 = vadd.f32 %v826_v24, %v798_v3 }
 0x11a   :  { %1013 = vmatpush.msra.mxu3 %v946_v44  ;;  %v803_v9 = vadd.f32 %v802_v31, %v773_v28 }
 0x11b   :  { %v847_v27 = vmax.f32 %v735_v26, %v740_v11  ;;  %v854_v29 = vmax.f32 %v822_v19, %v827_v47 }
 0x11c   :  { %1014 = vmatpush.msra.mxu3 %v945_v42 }
 0x11d   :  { %v805_v51 = vpop.f32.mrf.mxu3 }
 0x11e   :  { %1015 = vmatpush.msra.mxu3 %v944_v49  ;;  %v1401_v49 = vld [vmem:[%s2215_s4] ss:$0 sm:$0xff] }
 0x120   :  { %v742_v34 = vpop.f32.mrf.mxu1  ;;  %v829_v35 = vpop.f32.mrf.mxu0 }
 0x121   :  { %v743_v36 = vadd.f32 %v742_v34, %v2015_v54  ;;  %v929_v54 = vld [vmem:[%s2214_s3 + $0x98] sm:$0xff]  ;;  %v776_v50 = vpop.f32.mrf.mxu2  ;;  %v830_v62 = vadd.f32 %v829_v35, %v801_v5 }
 0x122   :  { %994 = vmatpush.msra.mxu2 %v929_v54  ;;  %v806_v37 = vadd.f32 %v805_v51, %v776_v50 }
 0x123   :  { %v2150_v38 = vmax.f32 %v846_v14, %v743_v36  ;;  %v853_v14 = vmax.f32 %v820_v7, %v825_v46 }
 0x124   :  { %995 = vmatpush.msra.mxu2 %v928_v48 }
 0x125   :  { %v807_v12 = vpop.f32.mrf.mxu3  ;;  %v855_v16 = vmax.f32 %v853_v14, %v830_v62 }
 0x126   :  { %996 = vmatpush.msra.mxu2 %v927_v53 }
 0x128   :  { %v744_v13 = vpop.f32.mrf.mxu1  ;;  %v831_v41 = vpop.f32.mrf.mxu0  ;;  %997 = vmatpush.msra.mxu2 %v926_v56 }
 0x129   :  { %v745_v45 = vadd.f32 %v744_v13, %v2034_v58  ;;  %v943_v58 = vld [vmem:[%s2214_s3 + $0x108] sm:$0xff]  ;;  %v778_v10 = vpop.f32.mrf.mxu2  ;;  %v832_v0 = vadd.f32 %v831_v41, %v803_v9 }
 0x12a   :  { %1016 = vmatpush.msra.mxu3 %v943_v58  ;;  %v808_v30 = vadd.f32 %v807_v12, %v778_v10 }
 0x12b   :  { %v849_v52 = vmax.f32 %v847_v27, %v745_v45  ;;  %v856_v17 = vmax.f32 %v854_v29, %v832_v0 }
 0x12c   :  { %1017 = vmatpush.msra.mxu3 %v942_v57 }
 0x130   :  { %v747_v61 = vpop.f32.mrf.mxu1  ;;  %v834_v1 = vpop.f32.mrf.mxu0 }
 0x131   :  { %v748_v6 = vadd.f32 %v747_v61, %v2053_v18  ;;  %v721_v18 = vadd.f32 %v2074_v33, %v2024_v63  ;;  %v835_v21 = vadd.f32 %v834_v1, %v806_v37 }
 0x133   :  { %v850_v8 = vmax.f32 %v2150_v38, %v748_v6  ;;  %v857_v23 = vmax.f32 %v855_v16, %v835_v21 }
 0x138   :  { %v749_v15 = vpop.f32.mrf.mxu1  ;;  %v836_v4 = vpop.f32.mrf.mxu0 }
 0x139   :  { %v750_v32 = vadd.f32 %v749_v15, %v721_v18  ;;  %v837_v22 = vadd.f32 %v836_v4, %v808_v30 }
 0x13b   :  { %v851_v24 = vmax.f32 %v849_v52, %v750_v32  ;;  %v858_v43 = vmax.f32 %v856_v17, %v837_v22 }
 0x13d   :  { %v852_v26 = vmax.f32 %v850_v8, %v851_v24  ;;  %v859_v59 = vmax.f32 %v857_v23, %v858_v43 }
 0x13f   :  { %v881_v11 = vrot.slane %v852_v26, 4  ;;  %v887_v27 = vrot.slane %v859_v59, 4 }
 0x141   :  { %v882_v28 = vmax.f32 %v852_v26, %v881_v11  ;;  %v888_v31 = vmax.f32 %v859_v59, %v887_v27 }
 0x143   :  { %v883_v63 = vrot.slane %v882_v28, 2  ;;  %v889_v33 = vrot.slane %v888_v31, 2 }
 0x145   :  { %v884_v34 = vmax.f32 %v882_v28, %v883_v63  ;;  %v890_v35 = vmax.f32 %v888_v31, %v889_v33 }
 0x147   :  { %v885_v36 = vrot.slane %v884_v34, 1  ;;  %v891_v38 = vrot.slane %v890_v35, 1 }
 0x149   :  { %v886_v25 = vmax.f32 %v884_v34, %v885_v36  ;;  %v892_v44 = vmax.f32 %v890_v35, %v891_v38 }
 0x14b   :  { %v902_v54 = vadd.f32 %v896_v39, %v886_v25  ;;  %v903_v13 = vadd.f32 %v897_v40, %v892_v44 }
 0x14d   :  { %v905_v41 = vmax.f32 %v902_v54, 0.0  ;;  %v906_v42 = vmax.f32 %v903_v13, 0.0 }
 0x14f   :  { %v908_v45 = vperm.slane %v905_v41, 0  ;;  %v909_v48 = vperm.slane %v906_v42, 0 }
 0x151   :  { %998 = vmatmul.f32.vlgmr.msra.gmra.mxu2 %v908_v45  ;;  %1018 = vmatmul.f32.vlgmr.msra.gmra.mxu3 %v909_v48 }
 0x190   :  { %v979_v50 = vpop.f32.mrf.mxu1 }
 0x191   :  { %v980_v51 = vadd.f32 %v1401_v49, %v979_v50 }
 0x1d4   :  { %v999_v52 = vpop.f32.mrf.mxu2  ;;  %v1019_v58 = vpop.f32.mrf.mxu3 }
 0x1d5   :  { %v1000_v53 = vadd.f32 %v999_v52, %v980_v51 }
 0x1d7   :  { %v1020_v55 = vadd.f32 %v1019_v58, %v1000_v53 }
 0x1d9   :  { %1022 = vst [vmem:[%s2217_s5] sm:$0xff] %v1020_v55 }

</bundles_post_ra>
